<compile_context>
chip_gen: v7x
topology: tpu7x:2x2x1
jax: 0.10.0
libtpu: 0.0.40
codegen_flags: <defaults>
</compile_context>

<pallas_src>
import numpy as np
import jax
import jax.numpy as jnp
from jax import lax
from jax.experimental import pallas as pl
from jax.experimental.pallas import tpu as pltpu  # noqa: F401  (no grid / specs needed for this kernel)

# ---------------- model hyper-parameters (small, consistent with the module) ----------
B         = 2      # batch
C_IN      = 4      # in_channels
C_OUT     = 8      # out_channels
D         = 2      # 3rd-from-last Conv3d spatial dim (hemisphere / branch dim in EEGSym)
H         = 5      # EEG channels per branch
SPATIAL_K = 5      # spatial_kernel == H so the 'valid' spatial conv collapses H -> 1
W         = 16     # time samples
K         = 3      # temporal kernel_size (odd -> symmetric 'same' padding)
PAD       = (K - 1) // 2
POOL      = 2      # AvgPool kernel == stride
WP        = W // POOL
ALPHA     = 1.0    # ELU alpha
EPS       = 1e-5   # BatchNorm eps
# dropRate: Dropout3d is the identity at inference.

R_IN  = C_IN * D * H          # 40   input rows  (c_in, d, h)
R_OUT = C_OUT * D * H         # 80   output rows (c_out, d, h)
CD    = C_OUT * D             # 16   rows after the spatial conv collapses H
KCOL  = K * R_IN + 1          # 121  im2col taps + constant ones row (bias folding)
BW    = B * W                 # 32   folded (batch, time) lane axis
BWP   = B * WP                # 16   folded (batch, pooled-time) lane axis

HIGHEST = lax.Precision.HIGHEST

# The residual `xp + xs` only broadcasts cleanly because the spatial conv collapses H -> 1.
assert SPATIAL_K == H, "EEGSymResBlock residual requires spatial_kernel == H"
assert K % 2 == 1 and W % POOL == 0


# ----------------------------------- the kernel ---------------------------------------
def _elu(x):
    # exp(min(x,0)) - 1 instead of expm1: guaranteed Mosaic lowering; the accuracy delta
    # near x ~ 0- is <= 1 ulp of 1.0, far below the test tolerance.
    return jnp.where(x > 0, x, ALPHA * (jnp.exp(jnp.minimum(x, 0.0)) - 1.0))


def eegsym_resblock_kernel(xs_ref, wt_ref, p_ref, wsb_ref, bsb_ref, out_ref):
    # temporal1 + temporal2 fused into ONE bf16 MXU matmul; BN scale and conv bias are
    # folded into wt (the bias column multiplies the constant ones row of xs).
    y = jnp.dot(wt_ref[...], xs_ref[...], preferred_element_type=jnp.float32)   # (2*R_OUT, BW) f32
    xsum = _elu(y[:R_OUT]) + _elu(y[R_OUT:])                                     # (R_OUT, BW)

    # avg-pool over time: batch-block-diagonal 0/0.5 matrix.  HIGHEST keeps the residual
    # path exact; the matmul is tiny so the extra passes are negligible.
    xp = jnp.dot(xsum, p_ref[...], preferred_element_type=jnp.float32,
                 precision=HIGHEST)                                              # (R_OUT, BWP)

    # spatial 'valid' conv over H (BN folded) with the residual H-broadcast pre-applied
    # to the weights host-side (ELU commutes with the 0/1 row replication).
    s = _elu(jnp.dot(wsb_ref[...], xp, preferred_element_type=jnp.float32)
             + bsb_ref[...])                                                     # (R_OUT, BWP)

    out_ref[...] = xp + s


# ----------------------------------- host wrapper -------------------------------------
@jax.jit
def eegsym_resblock(x, kernel_params):
    """x: (B, C_IN, D, H, W) -> (B, C_OUT, D, H, WP)."""
    wt, p, wsb, bsb = kernel_params

    # XLA-side layout plumbing (free relative to the kernel): rows = (c_in, d, h),
    # lanes = (batch, time).  'same' padding, im2col and the bias ones-row are hoisted
    # out of the kernel so no lane shifts / sublane concats run on-chip.
    x2d = x.reshape(B, R_IN, W)
    xpad = jnp.pad(x2d, ((0, 0), (0, 0), (PAD, PAD)))
    cols = jnp.concatenate([xpad[:, :, k:k + W] for k in range(K)], axis=1)   # (B, K*R_IN, W)
    cols = jnp.concatenate([cols, jnp.ones((B, 1, W), x.dtype)], axis=1)      # (B, KCOL, W)
    xs = cols.transpose(1, 0, 2).reshape(KCOL, BW).astype(jnp.bfloat16)       # (KCOL, B*W)

    out2d = pl.pallas_call(
        eegsym_resblock_kernel,
        out_shape=jax.ShapeDtypeStruct((R_OUT, BWP), jnp.float32),
    )(xs, wt, p, wsb, bsb)

    # rows are (c_out, d, h); lanes are (batch, pooled-time)
    return out2d.reshape(R_OUT, B, WP).transpose(1, 0, 2).reshape(B, C_OUT, D, H, WP)


# ------------------------------ parameter construction --------------------------------
def make_params(key):
    keys = iter(jax.random.split(key, 20))

    def conv_w(shape):                      # PyTorch-style fan-in scaling
        fan_in = int(np.prod(shape[1:]))
        return jax.random.normal(next(keys), shape, jnp.float32) / np.sqrt(fan_in)

    def bias(c):
        return 0.1 * jax.random.normal(next(keys), (c,), jnp.float32)

    def bn(c):                              # eval-mode BN -> per-channel scale / shift
        gamma = 0.8 + 0.4 * jax.random.uniform(next(keys), (c,), jnp.float32)
        beta  = 0.1 * jax.random.normal(next(keys), (c,), jnp.float32)
        mean  = 0.1 * jax.random.normal(next(keys), (c,), jnp.float32)
        var   = 0.8 + 0.4 * jax.random.uniform(next(keys), (c,), jnp.float32)
        scale = gamma / jnp.sqrt(var + EPS)
        shift = beta - mean * scale
        return scale, shift

    # PyTorch-layout parameters (used by the pure-JAX reference)
    w1, b1 = conv_w((C_OUT, C_IN, 1, 1, K)), bias(C_OUT)          # temporal1
    s1, t1 = bn(C_OUT)
    w2, b2 = conv_w((C_OUT, C_IN, 1, 1, 1)), bias(C_OUT)          # temporal2
    s2, t2 = bn(C_OUT)
    w3, b3 = conv_w((C_OUT, C_OUT, 1, SPATIAL_K, 1)), bias(C_OUT) # spatial
    s3, t3 = bn(C_OUT)

    torch_params = dict(w1=w1, b1=b1, bn1=(s1, t1),
                        w2=w2, b2=b2, bn2=(s2, t2),
                        w3=w3, b3=b3, bn3=(s3, t3))

    # ---- host-side algebra: fold BN into convs, build structured matrices -------------
    w1n = np.asarray(w1)[:, :, 0, 0, :]                 # (C_OUT, C_IN, K)
    w2n = np.asarray(w2)[:, :, 0, 0, 0]                 # (C_OUT, C_IN)
    w3n = np.asarray(w3)[:, :, 0, :, 0]                 # (C_OUT, C_OUT, H)
    s1n, t1n = np.asarray(s1), np.asarray(t1)
    s2n, t2n = np.asarray(s2), np.asarray(t2)
    s3n, t3n = np.asarray(s3), np.asarray(t3)

    w1e = s1n[:, None, None] * w1n
    b1e = s1n * np.asarray(b1) + t1n
    w2e = s2n[:, None] * w2n
    b2e = s2n * np.asarray(b2) + t2n
    w3e = s3n[:, None, None] * w3n
    b3e = s3n * np.asarray(b3) + t3n

    DH = D * H
    I_DH = np.eye(DH, dtype=np.float32)

    # fused temporal1 + temporal2 weights; rows [0:R_OUT] = temporal1, [R_OUT:] = temporal2;
    # last column = folded bias (multiplies the constant ones row of the im2col operand).
    WT = np.zeros((2 * R_OUT, KCOL), np.float32)
    for k in range(K):
        WT[:R_OUT, k * R_IN:(k + 1) * R_IN] = np.kron(w1e[:, :, k], I_DH)
    WT[R_OUT:, PAD * R_IN:(PAD + 1) * R_IN] = np.kron(w2e, I_DH)   # centre (unshifted) view
    WT[:R_OUT, K * R_IN] = np.repeat(b1e, DH)
    WT[R_OUT:, K * R_IN] = np.repeat(b2e, DH)

    # batch-block-diagonal average-pool matrix over the folded (batch, time) lane axis.
    P = np.zeros((BW, BWP), np.float32)
    for b in range(B):
        for j in range(WP):
            P[b * W + POOL * j: b * W + POOL * j + POOL, b * WP + j] = 1.0 / POOL

    # spatial conv ('valid' over H) with BN folded: (CD, R_OUT) ...
    WS = np.zeros((CD, R_OUT), np.float32)
    for o in range(C_OUT):
        for i in range(C_OUT):
            for d in range(D):
                for h in range(H):
                    WS[o * D + d, (i * D + d) * H + h] = w3e[o, i, h]
    # ... then fold the residual H-broadcast (0/1 row replication E) into the weights:
    # E @ ELU(WS @ xp + bS) == ELU((E @ WS) @ xp + (E @ bS)) since ELU is elementwise.
    WSB = np.repeat(WS, H, axis=0)                                       # (R_OUT, R_OUT)
    bSB = np.repeat(np.repeat(b3e, D), H).astype(np.float32)[:, None]    # (R_OUT, 1)

    kernel_params = (jnp.asarray(WT, jnp.bfloat16),   # big temporal weights -> bf16 DMA
                     jnp.asarray(P, jnp.float32),
                     jnp.asarray(WSB, jnp.float32),
                     jnp.asarray(bSB, jnp.float32))
    return torch_params, kernel_params


# ------------------------------- pure-JAX reference ------------------------------------
def reference_forward(x, tp):
    dn = ('NCDHW', 'OIDHW', 'NCDHW')

    def conv(h, w, b, pad):
        out = lax.conv_general_dilated(h, w, (1, 1, 1), pad,
                                       dimension_numbers=dn, precision=HIGHEST)
        return out + b[None, :, None, None, None]

    def bn(h, st):
        s, t = st
        return h * s[None, :, None, None, None] + t[None, :, None, None, None]

    def elu(h):
        return jnp.where(h > 0, h, ALPHA * jnp.expm1(jnp.minimum(h, 0.0)))

    x1 = elu(bn(conv(x, tp['w1'], tp['b1'], [(0, 0), (0, 0), (PAD, PAD)]), tp['bn1']))
    x2 = elu(bn(conv(x, tp['w2'], tp['b2'], [(0, 0), (0, 0), (0, 0)]), tp['bn2']))
    xsum = x1 + x2
    xp = lax.reduce_window(xsum, 0.0, lax.add,
                           (1, 1, 1, 1, POOL), (1, 1, 1, 1, POOL), 'VALID') / POOL
    xs = elu(bn(conv(xp, tp['w3'], tp['b3'], [(0, 0), (0, 0), (0, 0)]), tp['bn3']))
    return xp + xs                                   # xs (H=1) broadcasts over H, as in PyTorch


# ------------------------------------- main ---------------------------------------------
if __name__ == "__main__":
    key = jax.random.PRNGKey(0)
    kx, kp = jax.random.split(key)
    x = jax.random.normal(kx, (B, C_IN, D, H, W), jnp.float32)
    torch_params, kernel_params = make_params(kp)

    out = eegsym_resblock(x, kernel_params)
    out = jax.block_until_ready(out)

    ref = reference_forward(x, torch_params)
    assert out.shape == ref.shape == (B, C_OUT, D, H, WP), (out.shape, ref.shape)
    np.testing.assert_allclose(np.asarray(out), np.asarray(ref), rtol=2e-2, atol=2e-2)
    assert not np.isnan(np.asarray(out)).any()
    print("KERNEL_OK")
</pallas_src>

<mosaic_0001>
module attributes {stable_mosaic.version = 11 : i64} {
  func.func @eegsym_resblock_kernel(%arg0: memref<121x32xbf16, #tpu.memory_space<vmem>>, %arg1: memref<160x121xbf16, #tpu.memory_space<vmem>>, %arg2: memref<32x16xf32, #tpu.memory_space<vmem>>, %arg3: memref<80x80xf32, #tpu.memory_space<vmem>>, %arg4: memref<80x1xf32, #tpu.memory_space<vmem>>, %arg5: memref<80x16xf32, #tpu.memory_space<vmem>>) attributes {dimension_semantics = [], scalar_prefetch = 0 : i64, scratch_operands = 0 : i64, tpu.core_type = #tpu.core_type<tc>} {
    %c0 = arith.constant 0 : index
    %c0_0 = arith.constant 0 : index
    %0 = vector.load %arg1[%c0, %c0_0] : memref<160x121xbf16, #tpu.memory_space<vmem>>, vector<160x121xbf16>
    %c0_1 = arith.constant 0 : index
    %c0_2 = arith.constant 0 : index
    %1 = vector.load %arg0[%c0_1, %c0_2] : memref<121x32xbf16, #tpu.memory_space<vmem>>, vector<121x32xbf16>
    %cst = arith.constant dense<0.000000e+00> : vector<160x32xf32>
    %2 = tpu.matmul %0, %1, %cst {dimension_numbers = #tpu.dot_dimension_numbers<[1], [0], [0], [1], [0, 0, 1, 1], [], []>} : vector<160x121xbf16>, vector<121x32xbf16>, vector<160x32xf32> -> vector<160x32xf32>
    %3 = vector.extract_strided_slice %2 {offsets = [0, 0], sizes = [80, 32], strides = [1, 1]} : vector<160x32xf32> to vector<80x32xf32>
    %cst_3 = arith.constant 0.000000e+00 : f32
    %4 = vector.broadcast %cst_3 : f32 to vector<80x32xf32>
    %5 = arith.cmpf ogt, %3, %4 : vector<80x32xf32>
    %cst_4 = arith.constant 0.000000e+00 : f32
    %6 = vector.broadcast %cst_4 : f32 to vector<80x32xf32>
    %7 = arith.minimumf %3, %6 : vector<80x32xf32>
    %8 = math.exp %7 : vector<80x32xf32>
    %cst_5 = arith.constant 1.000000e+00 : f32
    %9 = vector.broadcast %cst_5 : f32 to vector<80x32xf32>
    %10 = arith.subf %8, %9 : vector<80x32xf32>
    %cst_6 = arith.constant 1.000000e+00 : f32
    %11 = vector.broadcast %cst_6 : f32 to vector<80x32xf32>
    %12 = arith.mulf %11, %10 : vector<80x32xf32>
    %13 = arith.select %5, %3, %12 : vector<80x32xi1>, vector<80x32xf32>
    %14 = vector.extract_strided_slice %2 {offsets = [80, 0], sizes = [80, 32], strides = [1, 1]} : vector<160x32xf32> to vector<80x32xf32>
    %cst_7 = arith.constant 0.000000e+00 : f32
    %15 = vector.broadcast %cst_7 : f32 to vector<80x32xf32>
    %16 = arith.cmpf ogt, %14, %15 : vector<80x32xf32>
    %cst_8 = arith.constant 0.000000e+00 : f32
    %17 = vector.broadcast %cst_8 : f32 to vector<80x32xf32>
    %18 = arith.minimumf %14, %17 : vector<80x32xf32>
    %19 = math.exp %18 : vector<80x32xf32>
    %cst_9 = arith.constant 1.000000e+00 : f32
    %20 = vector.broadcast %cst_9 : f32 to vector<80x32xf32>
    %21 = arith.subf %19, %20 : vector<80x32xf32>
    %cst_10 = arith.constant 1.000000e+00 : f32
    %22 = vector.broadcast %cst_10 : f32 to vector<80x32xf32>
    %23 = arith.mulf %22, %21 : vector<80x32xf32>
    %24 = arith.select %16, %14, %23 : vector<80x32xi1>, vector<80x32xf32>
    %25 = arith.addf %13, %24 : vector<80x32xf32>
    %c0_11 = arith.constant 0 : index
    %c0_12 = arith.constant 0 : index
    %26 = vector.load %arg2[%c0_11, %c0_12] : memref<32x16xf32, #tpu.memory_space<vmem>>, vector<32x16xf32>
    %cst_13 = arith.constant dense<0.000000e+00> : vector<80x16xf32>
    %27 = tpu.matmul %25, %26, %cst_13 {dimension_numbers = #tpu.dot_dimension_numbers<[1], [0], [0], [1], [0, 0, 1, 1], [], []>, precision = #tpu.contract_precision<fp32>} : vector<80x32xf32>, vector<32x16xf32>, vector<80x16xf32> -> vector<80x16xf32>
    %c0_14 = arith.constant 0 : index
    %c0_15 = arith.constant 0 : index
    %28 = vector.load %arg3[%c0_14, %c0_15] : memref<80x80xf32, #tpu.memory_space<vmem>>, vector<80x80xf32>
    %cst_16 = arith.constant dense<0.000000e+00> : vector<80x16xf32>
    %29 = tpu.matmul %28, %27, %cst_16 {dimension_numbers = #tpu.dot_dimension_numbers<[1], [0], [0], [1], [0, 0, 1, 1], [], []>} : vector<80x80xf32>, vector<80x16xf32>, vector<80x16xf32> -> vector<80x16xf32>
    %c0_17 = arith.constant 0 : index
    %c0_18 = arith.constant 0 : index
    %30 = vector.load %arg4[%c0_17, %c0_18] : memref<80x1xf32, #tpu.memory_space<vmem>>, vector<80x1xf32>
    %31 = vector.broadcast %30 : vector<80x1xf32> to vector<80x16xf32>
    %32 = arith.addf %29, %31 : vector<80x16xf32>
    %cst_19 = arith.constant 0.000000e+00 : f32
    %33 = vector.broadcast %cst_19 : f32 to vector<80x16xf32>
    %34 = arith.cmpf ogt, %32, %33 : vector<80x16xf32>
    %cst_20 = arith.constant 0.000000e+00 : f32
    %35 = vector.broadcast %cst_20 : f32 to vector<80x16xf32>
    %36 = arith.minimumf %32, %35 : vector<80x16xf32>
    %37 = math.exp %36 : vector<80x16xf32>
    %cst_21 = arith.constant 1.000000e+00 : f32
    %38 = vector.broadcast %cst_21 : f32 to vector<80x16xf32>
    %39 = arith.subf %37, %38 : vector<80x16xf32>
    %cst_22 = arith.constant 1.000000e+00 : f32
    %40 = vector.broadcast %cst_22 : f32 to vector<80x16xf32>
    %41 = arith.mulf %40, %39 : vector<80x16xf32>
    %42 = arith.select %34, %32, %41 : vector<80x16xi1>, vector<80x16xf32>
    %43 = arith.addf %27, %42 : vector<80x16xf32>
    %c0_23 = arith.constant 0 : index
    %c0_24 = arith.constant 0 : index
    %44 = vector.load %arg5[%c0_23, %c0_24] : memref<80x16xf32, #tpu.memory_space<vmem>>, vector<80x16xf32>
    tpu.vector_store %arg5[%c0_23, %c0_24], %43 {strides = array<i32>} : memref<80x16xf32, #tpu.memory_space<vmem>>, vector<80x16xf32>,
    return
  }
}

</mosaic_0001>

<bundles_post_ra>
// kernel: eegsym_resblock.1
= control target key start
LH: loop header
LB: loop body
LE: loop exit
PB: predicated region body
PF: predicated region fallthrough
CT: control target
= control target key end

     0   :  { %vm154_vm0 = vcmask 990208   ;;  %vm185_vm1 = vcmask 1043456   ;;  %vm186_vm2 = vcmask 1044480   ;;  %v2242_v7 = vmov 65535   ;;  %s2851_s0 = inlined_call_operand.vmem [shape: bf16[121,32], index: 0, kind: input, shape index: {}]   ;;  %s2852_s1 = inlined_call_operand.vmem [shape: bf16[160,121], index: 1, kind: input, shape index: {}]   ;;  %s2853_s2 = inlined_call_operand.vmem [shape: f32[32,16], index: 2, kind: input, shape index: {}]   ;;  %s2854_s3 = inlined_call_operand.vmem [shape: f32[80,80], index: 3, kind: input, shape index: {}]   ;;  %s2855_s4 = inlined_call_operand.vmem [shape: f32[80,1], index: 4, kind: input, shape index: {}]   ;;  %s2856_s5 = inlined_call_operand.vmem [shape: f32[80,16], index: 5, kind: output, shape index: {}]  }
   0x1   :  { %v2164_v0 = vld [vmem:[%s2851_s0] sm:$0xff]   ;;  %v2165_v1 = vld [vmem:[%s2851_s0 + $0x8] sm:$0xff]   ;;  %v2166_v2 = vld [vmem:[%s2851_s0 + $0x10] sm:$0xff]   ;;  %v187_v8 = vsel %vm185_vm1, 4294967295, %v2242_v7  ;;  %vm439_vm7 = vcmask 261120  }
   0x2   :  { %1833 = vmatprep.subr.bf16.mxu0 %v2164_v0  ;;  %v2167_v3 = vld [vmem:[%s2851_s0 + $0x18] sm:$0xff]   ;;  %v2172_v4 = vld [vmem:[%s2852_s1] sm:$0xff]   ;;  %v2169_v6 = vld [vmem:[%s2851_s0 + $0x28] sm:$0xff]   ;;  %v188_v11 = vsel %vm186_vm2, %v187_v8, 0 }
   0x3   :  { %1834 = vmatpush3.bf16.msra.mxu0 %v2164_v0  ;;  %1849 = vmatprep.mubr.msk.bf16.mxu0 %vm154_vm0, %v2172_v4  ;;  %v2168_v5 = vld [vmem:[%s2851_s0 + $0x20] sm:$0xff]   ;;  %v2170_v9 = vld [vmem:[%s2851_s0 + $0x30] sm:$0xff]   ;;  %v2171_v10 = vld [vmem:[%s2851_s0 + $0x38] sm:$0x1f]  }
   0x4   :  { %1835 = vmatprep.subr.bf16.mxu0 %v2165_v1  ;;  %v190_v12 = vand.u32 %v2171_v10, %v188_v11  ;;  %v2173_v13 = vld [vmem:[%s2852_s1 + $0x8] sm:$0xff]   ;;  %v2174_v14 = vld [vmem:[%s2852_s1 + $0x10] sm:$0xff]   ;;  %v2175_v15 = vld [vmem:[%s2852_s1 + $0x18] sm:$0xff]  }
   0x5   :  { %v2176_v16 = vld [vmem:[%s2852_s1 + $0x20] sm:$0xff]   ;;  %v2177_v17 = vld [vmem:[%s2852_s1 + $0x28] sm:$0xff]   ;;  %v2178_v18 = vld [vmem:[%s2852_s1 + $0x30] sm:$0xff]  }
   0x6   :  { %v2179_v19 = vld [vmem:[%s2852_s1 + $0x38] sm:$0xff]   ;;  %v2180_v20 = vld [vmem:[%s2852_s1 + $0x40] sm:$0xff]   ;;  %v2181_v21 = vld [vmem:[%s2852_s1 + $0x48] sm:$0xff]  }
   0x7   :  { %1836 = vmatpush3.bf16.msra.mxu0 %v2165_v1  ;;  %v435_v22 = vld [vmem:[%s2853_s2] sm:$0xff]  ;;  %v436_v23 = vld [vmem:[%s2853_s2 + $0x8] sm:$0xff]  ;;  %v437_v30 = vld [vmem:[%s2853_s2 + $0x10] sm:$0xff] }
   0x8   :  { %1837 = vmatprep.subr.bf16.mxu0 %v2166_v2  ;;  %v471_v24 = vand.u32 4294901760, %v435_v22  ;;  %v474_v25 = vand.u32 4294901760, %v436_v23  ;;  %v438_v31 = vld [vmem:[%s2853_s2 + $0x18] sm:$0xff]  ;;  %v477_v34 = vand.u32 4294901760, %v437_v30 }
   0x9   :  { %v480_v35 = vand.u32 4294901760, %v438_v31 }
   0xa   :  { %v641_v26 = vsub.f32 %v435_v22, %v471_v24  ;;  %v648_v27 = vsub.f32 %v436_v23, %v474_v25  ;;  %v655_v38 = vsub.f32 %v437_v30, %v477_v34  ;;  %v2350_v48 = vpack.c.bf16 %v474_v25, %v471_v24 }
   0xb   :  { %1838 = vmatpush3.bf16.msra.mxu0 %v2166_v2  ;;  %v662_v39 = vsub.f32 %v438_v31, %v480_v35  ;;  %v2354_v49 = vpack.c.bf16 %v480_v35, %v477_v34 }
   0xc   :  { %1839 = vmatprep.subr.bf16.mxu0 %v2167_v3  ;;  %v642_v28 = vand.u32 4294901760, %v641_v26  ;;  %v649_v29 = vand.u32 4294901760, %v648_v27  ;;  %v656_v41 = vand.u32 4294901760, %v655_v38  ;;  %v2358_v50 = vpack.c.bf16 %v648_v27, %v641_v26 }
   0xd   :  { %v663_v42 = vand.u32 4294901760, %v662_v39  ;;  %v2361_v51 = vpack.c.bf16 %v662_v39, %v655_v38 }
   0xe   :  { %v643_v32 = vsub.f32 %v641_v26, %v642_v28  ;;  %v650_v33 = vsub.f32 %v648_v27, %v649_v29  ;;  %v657_v43 = vsub.f32 %v655_v38, %v656_v41  ;;  %v2363_v52 = vpack.c.bf16 %v649_v29, %v642_v28 }
   0xf   :  { %1840 = vmatpush3.bf16.msra.mxu0 %v2167_v3  ;;  %v664_v44 = vsub.f32 %v662_v39, %v663_v42  ;;  %v2365_v53 = vpack.c.bf16 %v663_v42, %v656_v41 }
  0x10   :  { %1841 = vmatprep.subr.bf16.mxu0 %v2168_v5  ;;  %v644_v36 = vand.u32 4294901760, %v643_v32  ;;  %v651_v37 = vand.u32 4294901760, %v650_v33  ;;  %v658_v45 = vand.u32 4294901760, %v657_v43 }
  0x11   :  { %v665_v46 = vand.u32 4294901760, %v664_v44 }
  0x12   :  { %v2050_v40 = vpack.c.bf16 %v651_v37, %v644_v36 }
  0x13   :  { %1842 = vmatpush3.bf16.msra.mxu0 %v2168_v5  ;;  %v2054_v47 = vpack.c.bf16 %v665_v46, %v658_v45 }
  0x14   :  { %1843 = vmatprep.subr.bf16.mxu0 %v2169_v6  ;;  %2051 = vmatprep.subr.bf16.mxu1 %v2050_v40 }
  0x15   :  { %2053 = vmatpush3.bf16.msra.mxu1 %v2050_v40 }
  0x16   :  { %2055 = vmatprep.subr.bf16.mxu1 %v2054_v47 }
  0x17   :  { %1844 = vmatpush3.bf16.msra.mxu0 %v2169_v6 }
  0x18   :  { %1845 = vmatprep.subr.bf16.mxu0 %v2170_v9 }
  0x19   :  { %2057 = vmatpush3.bf16.msra.mxu1 %v2054_v47 }
  0x1a   :  { %2059 = vmatprep.subr.bf16.mxu1 %v2358_v50 }
  0x1b   :  { %1846 = vmatpush3.bf16.msra.mxu0 %v2170_v9 }
  0x1c   :  { %1847 = vmatprep.subr.bf16.mxu0 %v190_v12 }
  0x1f   :  { %1848 = vmatpush3.bf16.msra.mxu0 %v190_v12 }
  0x20   :  { %2043 = vmatprep.subr.bf16.mxu0 %v2350_v48 }
  0x22   :  { %1850 = vmatmul.mubr.msk.bf16.vlgmr.msra.gmra.mrb[0].mxu0 %vm154_vm0, %v2173_v13 }
  0x23   :  { %1853 = vmatprep.mubr.msk.bf16.mxu0 %vm154_vm0, %v2174_v14  ;;  %2045 = vmatpush3.bf16.msra.mxu0 %v2350_v48 }
  0x24   :  { %2047 = vmatprep.subr.bf16.mxu0 %v2354_v49 }
  0x27   :  { %2049 = vmatpush3.bf16.msra.mxu0 %v2354_v49 }
  0x2a   :  { %1854 = vmatmul.mubr.msk.bf16.gmra.mrb[4].mxu0 %vm154_vm0, %v2175_v15 }
  0x2b   :  { %1857 = vmatprep.mubr.msk.bf16.mxu0 %vm154_vm0, %v2176_v16 }
  0x32   :  { %1858 = vmatmul.mubr.msk.bf16.gmra.mrb[8].mxu0 %vm154_vm0, %v2177_v17 }
  0x33   :  { %1861 = vmatprep.mubr.msk.bf16.mxu0 %vm154_vm0, %v2178_v18 }
  0x3a   :  { %1862 = vmatmul.mubr.msk.bf16.gmra.mrb[12].mxu0 %vm154_vm0, %v2179_v19 }
  0x3b   :  { %1865 = vmatprep.mubr.msk.bf16.mxu0 %vm154_vm0, %v2180_v20 }
  0x42   :  { %1866 = vmatmul.mubr.msk.bf16.gmra.mrb[16].mxu0 %vm154_vm0, %v2181_v21 }
  0xf5   :  { %v2367_v54 = vpop.f32.mrb[0].mxu0 }
  0xf6   :  { %v2369_v55 = vpop.f32.mrb[1].mxu0  ;;  %v317_v58 = vmin.f32 %v2367_v54, 0.0  ;;  %vm307_vm3 = vcmp.gt.f32.partialorder %v2367_v54, 0.0 }
  0xf7   :  { %v2371_v56 = vpop.f32.mrb[2].mxu0  ;;  %v315_v59 = vmin.f32 %v2369_v55, 0.0  ;;  %vm305_vm4 = vcmp.gt.f32.partialorder %v2369_v55, 0.0 }
  0xf8   :  { %v2373_v57 = vpop.f32.mrb[3].mxu0  ;;  %v318_v60 = vmin.f32 %v2371_v56, 0.0  ;;  %v329_v63 = vmul.f32 1.442695, %v317_v58  ;;  %vm308_vm5 = vcmp.gt.f32.partialorder %v2371_v56, 0.0 }
  0xf9   :  { %v316_v61 = vmin.f32 %v2373_v57, 0.0  ;;  %v325_v2 = vmul.f32 1.442695, %v315_v59  ;;  %vm306_vm6 = vcmp.gt.f32.partialorder %v2373_v57, 0.0 }
  0xfa   :  { %v331_v4 = vmul.f32 1.442695, %v318_v60  ;;  %2182 = vpow2.f32 %v329_v63 }
  0xfb   :  { %v327_v6 = vmul.f32 1.442695, %v316_v61  ;;  %2184 = vpow2.f32 %v325_v2 }
  0xfc   :  { %2186 = vpow2.f32 %v331_v4 }
  0xfd   :  { %v2379_v62 = vpop.f32.mrb[4].mxu0  ;;  %2188 = vpow2.f32 %v327_v6 }
  0xfe   :  { %v321_v0 = vmin.f32 %v2379_v62, 0.0  ;;  %v2382_v1 = vpop.f32.mrb[5].mxu0  ;;  %vm311_vm8 = vcmp.gt.f32.partialorder %v2379_v62, 0.0 }
  0xff   :  { %v2384_v3 = vpop.f32.mrb[6].mxu0  ;;  %v319_v7 = vmin.f32 %v2382_v1, 0.0  ;;  %vm309_vm9 = vcmp.gt.f32.partialorder %v2382_v1, 0.0 }
 0x100   :  { %v2386_v5 = vpop.f32.mrb[7].mxu0  ;;  %v337_v8 = vmul.f32 1.442695, %v321_v0  ;;  %v322_v9 = vmin.f32 %v2384_v3, 0.0 }
 0x101   :  { %v320_v10 = vmin.f32 %v2386_v5, 0.0  ;;  %v333_v11 = vmul.f32 1.442695, %v319_v7  ;;  %vm310_vm11 = vcmp.gt.f32.partialorder %v2386_v5, 0.0 }
 0x102   :  { %2190 = vpow2.f32 %v337_v8  ;;  %v339_v15 = vmul.f32 1.442695, %v322_v9 }
 0x103   :  { %v335_v18 = vmul.f32 1.442695, %v320_v10  ;;  %2192 = vpow2.f32 %v333_v11 }
 0x104   :  { %v2183_v24 = vpop.eup %2182 }
 0x105   :  { %v2391_v12 = vpop.f32.mrb[8].mxu0  ;;  %v2185_v26 = vpop.eup %2184  ;;  %v1673_v32 = vadd.f32 -1.0, %v2183_v24 }
 0x106   :  { %v375_v13 = vmin.f32 %v2391_v12, 0.0  ;;  %v2394_v14 = vpop.f32.mrb[9].mxu0  ;;  %v2187_v28 = vpop.eup %2186  ;;  %v1671_v36 = vadd.f32 -1.0, %v2185_v26  ;;  %vm365_vm10 = vcmp.gt.f32.partialorder %v2391_v12, 0.0 }
 0x107   :  { %v323_v16 = vmin.f32 %v2394_v14, 0.0  ;;  %v2397_v17 = vpop.f32.mrb[10].mxu0  ;;  %v2189_v31 = vpop.eup %2188  ;;  %v1674_v40 = vadd.f32 -1.0, %v2187_v28  ;;  %v2425_v59 = vsel %vm307_vm3, %v2367_v54, %v1673_v32  ;;  %vm313_vm13 = vcmp.gt.f32.partialorder %v2394_v14, 0.0 }
 0x108   :  { %v385_v19 = vmul.f32 1.442695, %v375_v13  ;;  %v2399_v20 = vpop.f32.mrb[11].mxu0  ;;  %v376_v21 = vmin.f32 %v2397_v17, 0.0  ;;  %v1672_v43 = vadd.f32 -1.0, %v2189_v31  ;;  %v355_v60 = vsel %vm305_vm4, %v2369_v55, %v1671_v36 }
 0x109   :  { %v341_v22 = vmul.f32 1.442695, %v323_v16  ;;  %v324_v25 = vmin.f32 %v2399_v20, 0.0  ;;  %v2434_v0 = vsel %vm308_vm5, %v2371_v56, %v1674_v40  ;;  %vm366_vm12 = vcmp.gt.f32.partialorder %v2397_v17, 0.0 }
 0x10a   :  { %2194 = vpow2.f32 %v385_v19  ;;  %v387_v23 = vmul.f32 1.442695, %v376_v21  ;;  %v356_v55 = vsel %vm306_vm6, %v2373_v57, %v1672_v43  ;;  %vm314_vm4 = vcmp.gt.f32.partialorder %v2399_v20, 0.0 }
 0x10b   :  { %2196 = vpow2.f32 %v339_v15  ;;  %v343_v37 = vmul.f32 1.442695, %v324_v25  ;;  %vm312_vm5 = vcmp.gt.f32.partialorder %v2384_v3, 0.0 }
 0x10c   :  { %2198 = vpow2.f32 %v335_v18  ;;  %v2191_v35 = vpop.eup %2190 }
 0x10d   :  { %2200 = vpow2.f32 %v387_v23  ;;  %v2403_v27 = vpop.f32.mrb[12].mxu0  ;;  %v2193_v45 = vpop.eup %2192  ;;  %v1677_v46 = vadd.f32 -1.0, %v2191_v35 }
 0x10e   :  { %2202 = vpow2.f32 %v341_v22  ;;  %v379_v29 = vmin.f32 %v2403_v27, 0.0  ;;  %v2408_v30 = vpop.f32.mrb[13].mxu0  ;;  %v1675_v6 = vadd.f32 -1.0, %v2193_v45  ;;  %vm369_vm14 = vcmp.gt.f32.partialorder %v2403_v27, 0.0 }
 0x10f   :  { %v377_v33 = vmin.f32 %v2408_v30, 0.0  ;;  %v2413_v34 = vpop.f32.mrb[14].mxu0  ;;  %v2449_v9 = vsel %vm311_vm8, %v2379_v62, %v1677_v46  ;;  %vm367_vm15 = vcmp.gt.f32.partialorder %v2408_v30, 0.0 }
 0x110   :  { %v393_v38 = vmul.f32 1.442695, %v379_v29  ;;  %v2415_v39 = vpop.f32.mrb[15].mxu0  ;;  %v380_v42 = vmin.f32 %v2413_v34, 0.0  ;;  %v359_v23 = vsel %vm309_vm9, %v2382_v1, %v1675_v6  ;;  %vm370_vm0 = vcmp.gt.f32.partialorder %v2413_v34, 0.0 }
 0x111   :  { %v389_v41 = vmul.f32 1.442695, %v377_v33  ;;  %v378_v44 = vmin.f32 %v2415_v39, 0.0  ;;  %vm368_vm1 = vcmp.gt.f32.partialorder %v2415_v39, 0.0  ;;  %vm1628_vm9 = vcmask 130048  }
 0x112   :  { %2204 = vpow2.f32 %v393_v38  ;;  %v395_v47 = vmul.f32 1.442695, %v380_v42 }
 0x113   :  { %2206 = vpow2.f32 %v389_v41  ;;  %v391_v61 = vmul.f32 1.442695, %v378_v44 }
 0x114   :  { %v2195_v58 = vpop.eup %2194  ;;  %2208 = vpow2.f32 %v343_v37 }
 0x115   :  { %v2197_v63 = vpop.eup %2196  ;;  %v1681_v2 = vadd.f32 -1.0, %v2195_v58  ;;  %2210 = vpow2.f32 %v395_v47  ;;  %v2437_v54 = vpop.f32.mrb[16].mxu0 }
 0x116   :  { %v2199_v4 = vpop.eup %2198  ;;  %2212 = vpow2.f32 %v391_v61  ;;  %v383_v7 = vmin.f32 %v2437_v54, 0.0  ;;  %v2444_v8 = vpop.f32.mrb[17].mxu0  ;;  %v2458_v15 = vadd.f32 -1.0, %v2197_v63  ;;  %vm373_vm2 = vcmp.gt.f32.partialorder %v2437_v54, 0.0 }
 0x117   :  { %v2201_v56 = vpop.eup %2200  ;;  %v415_v10 = vsel %vm365_vm10, %v2391_v12, %v1681_v2  ;;  %v381_v57 = vmin.f32 %v2444_v8, 0.0  ;;  %v2456_v11 = vpop.f32.mrb[18].mxu0  ;;  %v1676_v62 = vadd.f32 -1.0, %v2199_v4  ;;  %vm371_vm3 = vcmp.gt.f32.partialorder %v2444_v8, 0.0 }
 0x118   :  { %v2203_v13 = vpop.eup %2202  ;;  %v425_v16 = vadd.f32 %v415_v10, %v355_v60  ;;  %v1682_v18 = vadd.f32 -1.0, %v2201_v56  ;;  %v401_v19 = vmul.f32 1.442695, %v383_v7  ;;  %v2460_v21 = vpop.f32.mrb[19].mxu0  ;;  %v384_v12 = vmin.f32 %v2456_v11, 0.0 }
 0x119   :  { %v397_v22 = vmul.f32 1.442695, %v381_v57  ;;  %v1679_v28 = vadd.f32 -1.0, %v2203_v13  ;;  %v382_v1 = vmin.f32 %v2460_v21, 0.0  ;;  %v360_v35 = vsel %vm310_vm11, %v2386_v5, %v1676_v62 }
 0x11a   :  { %v441_v24 = vsel %vm439_vm7, %v425_v16, 0  ;;  %v416_v25 = vsel %vm366_vm12, %v2397_v17, %v1682_v18  ;;  %2214 = vpow2.f32 %v401_v19  ;;  %v403_v32 = vmul.f32 1.442695, %v384_v12 }
 0x11b   :  { %v2471_v26 = vand.u32 4294901760, %v441_v24  ;;  %v426_v29 = vadd.f32 %v416_v25, %v356_v55  ;;  %2216 = vpow2.f32 %v397_v22  ;;  %v399_v42 = vmul.f32 1.442695, %v382_v1 }
 0x11c   :  { %v2205_v31 = vpop.eup %2204  ;;  %2218 = vpow2.f32 %v403_v32  ;;  %v363_v5 = vsel %vm313_vm13, %v2394_v14, %v1679_v28  ;;  %vm374_vm6 = vcmp.gt.f32.partialorder %v2456_v11, 0.0  ;;  %vm372_vm8 = vcmp.gt.f32.partialorder %v2460_v21, 0.0 }
 0x11d   :  { %v2207_v33 = vpop.eup %2206  ;;  %v2480_v17 = vsub.f32 %v441_v24, %v2471_v26  ;;  %v444_v36 = vsel %vm439_vm7, %v426_v29, 0  ;;  %v1685_v37 = vadd.f32 -1.0, %v2205_v31  ;;  %1900 = vmatprep.mubr.f32.mxu1 %v2471_v26  ;;  %2220 = vpow2.f32 %v399_v42 }
 0x11e   :  { %v2209_v38 = vpop.eup %2208  ;;  %v2484_v40 = vand.u32 4294901760, %v444_v36  ;;  %v1683_v41 = vadd.f32 -1.0, %v2207_v33 }
 0x11f   :  { %v2211_v43 = vpop.eup %2210  ;;  %v419_v44 = vsel %vm369_vm14, %v2403_v27, %v1685_v37  ;;  %v541_v45 = vand.u32 4294901760, %v2480_v17  ;;  %v1680_v4 = vadd.f32 -1.0, %v2209_v38 }
 0x120   :  { %v2213_v46 = vpop.eup %2212  ;;  %v2496_v47 = vsub.f32 %v444_v36, %v2484_v40  ;;  %v429_v58 = vadd.f32 %v419_v44, %v359_v23  ;;  %v417_v60 = vsel %vm367_vm15, %v2408_v30, %v1683_v41  ;;  %v1686_v14 = vadd.f32 -1.0, %v2211_v43  ;;  %1901 = vmatmul.mubr.f32.vlgmr.msra.gmra.mrb[0].mxu1 %v2484_v40 }
 0x121   :  { %v427_v27 = vadd.f32 %v417_v60, %v2425_v59  ;;  %v1684_v61 = vadd.f32 -1.0, %v2213_v46  ;;  %v542_v63 = vsub.f32 %v2480_v17, %v541_v45  ;;  %2061 = vmatpush3.bf16.msra.mxu1 %v2358_v50 }
 0x122   :  { %v551_v2 = vand.u32 4294901760, %v2496_v47  ;;  %v453_v55 = vsel %vm439_vm7, %v429_v58, 0  ;;  %v420_v30 = vsel %vm370_vm0, %v2413_v34, %v1686_v14  ;;  %2063 = vmatprep.subr.bf16.mxu1 %v2361_v51  ;;  %v362_v14 = vsel %vm312_vm5, %v2384_v3, %v2458_v15 }
 0x123   :  { %v2514_v59 = vand.u32 4294901760, %v453_v55  ;;  %v447_v6 = vsel %vm439_vm7, %v427_v27, 0  ;;  %v430_v7 = vadd.f32 %v420_v30, %v360_v35  ;;  %v418_v50 = vsel %vm368_vm1, %v2415_v39, %v1684_v61 }
 0x124   :  { %v2215_v56 = vpop.eup %2214  ;;  %v552_v10 = vsub.f32 %v2496_v47, %v551_v2  ;;  %v2524_v57 = vand.u32 4294901760, %v447_v6  ;;  %v428_v34 = vadd.f32 %v418_v50, %v2434_v0  ;;  %v543_v13 = vand.u32 4294901760, %v542_v63 }
 0x125   :  { %v2217_v16 = vpop.eup %2216  ;;  %v2528_v18 = vsub.f32 %v453_v55, %v2514_v59  ;;  %v456_v19 = vsel %vm439_vm7, %v430_v7, 0  ;;  %v1689_v62 = vadd.f32 -1.0, %v2215_v56  ;;  %2065 = vmatpush3.bf16.msra.mxu1 %v2361_v51 }
 0x126   :  { %v2534_v39 = vsub.f32 %v447_v6, %v2524_v57  ;;  %v2536_v22 = vand.u32 4294901760, %v456_v19  ;;  %v450_v12 = vsel %vm439_vm7, %v428_v34, 0  ;;  %v1687_v0 = vadd.f32 -1.0, %v2217_v16  ;;  %1877 = vmatprep.mubr.f32.mxu0 %v543_v13  ;;  %1903 = vmatprep.mubr.f32.mxu1 %v2524_v57  ;;  %v2219_v28 = vpop.eup %2218 }
 0x127   :  { %v2540_v23 = vand.u32 4294901760, %v450_v12  ;;  %v423_v24 = vsel %vm373_vm2, %v2437_v54, %v1689_v62  ;;  %v553_v25 = vand.u32 4294901760, %v552_v10  ;;  %v581_v51 = vand.u32 4294901760, %v2528_v18  ;;  %2067 = vmatprep.subr.bf16.mxu1 %v2350_v48  ;;  %v2221_v41 = vpop.eup %2220 }
 0x128   :  { %v2548_v29 = vsub.f32 %v456_v19, %v2536_v22  ;;  %v433_v31 = vadd.f32 %v423_v24, %v363_v5  ;;  %v421_v32 = vsel %vm371_vm3, %v2444_v8, %v1687_v0  ;;  %v561_v1 = vand.u32 4294901760, %v2534_v39 }
 0x129   :  { %v364_v54 = vsel %vm314_vm4, %v2399_v20, %v1680_v4  ;;  %v2558_v33 = vsub.f32 %v450_v12, %v2540_v23  ;;  %v431_v35 = vadd.f32 %v421_v32, %v2449_v9  ;;  %v1690_v36 = vadd.f32 -1.0, %v2219_v28  ;;  %1878 = vmatmul.mubr.f32.vlgmr.msra.gmra.mrb[20].mxu0 %v553_v25  ;;  %1904 = vmatmul.mubr.f32.gmra.mrb[2].mxu1 %v2540_v23 }
 0x12a   :  { %v465_v37 = vsel %vm439_vm7, %v433_v31, 0  ;;  %1906 = vmatprep.mubr.f32.mxu1 %v2514_v59  ;;  %v562_v8 = vsub.f32 %v2534_v39, %v561_v1  ;;  %v582_v20 = vsub.f32 %v2528_v18, %v581_v51  ;;  %v591_v38 = vand.u32 4294901760, %v2548_v29 }
 0x12b   :  { %v2571_v9 = vand.u32 4294901760, %v465_v37  ;;  %v459_v42 = vsel %vm439_vm7, %v431_v35, 0  ;;  %v424_v43 = vsel %vm374_vm6, %v2456_v11, %v1690_v36  ;;  %v571_v5 = vand.u32 4294901760, %v2558_v33 }
 0x12c   :  { %v2578_v44 = vand.u32 4294901760, %v459_v42  ;;  %v434_v46 = vadd.f32 %v424_v43, %v364_v54  ;;  %v1688_v58 = vadd.f32 -1.0, %v2221_v41  ;;  %v563_v60 = vand.u32 4294901760, %v562_v8 }
 0x12d   :  { %1907 = vmatmul.mubr.f32.gmra.mrb[4].mxu1 %v2536_v22  ;;  %v572_v11 = vsub.f32 %v2558_v33, %v571_v5  ;;  %v2590_v27 = vsub.f32 %v465_v37, %v2571_v9  ;;  %v592_v30 = vsub.f32 %v2548_v29, %v591_v38  ;;  %v583_v6 = vand.u32 4294901760, %v582_v20 }
 0x12e   :  { %v600_v61 = vsub.f32 %v459_v42, %v2578_v44  ;;  %v468_v63 = vsel %vm439_vm7, %v434_v46, 0  ;;  %v422_v4 = vsel %vm372_vm8, %v2460_v21, %v1688_v58  ;;  %1880 = vmatprep.mubr.f32.mxu0 %v563_v60  ;;  %1909 = vmatprep.mubr.f32.mxu1 %v2578_v44 }
 0x12f   :  { %v2596_v3 = vand.u32 4294901760, %v468_v63  ;;  %v432_v15 = vadd.f32 %v422_v4, %v362_v14  ;;  %v573_v55 = vand.u32 4294901760, %v572_v11  ;;  %v593_v34 = vand.u32 4294901760, %v592_v30 }
 0x130   :  { %v601_v7 = vand.u32 4294901760, %v600_v61  ;;  %v621_v13 = vand.u32 4294901760, %v2590_v27 }
 0x131   :  { %v462_v50 = vsel %vm439_vm7, %v432_v15, 0  ;;  %1881 = vmatmul.mubr.f32.gmra.mrb[22].mxu0 %v573_v55  ;;  %v630_v56 = vsub.f32 %v468_v63, %v2596_v3  ;;  %vm1412_vm7 = vcmask 654336  }
 0x132   :  { %v2603_v10 = vand.u32 4294901760, %v462_v50  ;;  %1883 = vmatprep.mubr.f32.mxu0 %v583_v6  ;;  %v602_v21 = vsub.f32 %v600_v61, %v601_v7  ;;  %v622_v0 = vsub.f32 %v2590_v27, %v621_v13 }
 0x133   :  { %v631_v12 = vand.u32 4294901760, %v630_v56 }
 0x134   :  { %v610_v16 = vsub.f32 %v462_v50, %v2603_v10  ;;  %1910 = vmatmul.mubr.f32.gmra.mrb[6].mxu1 %v2603_v10  ;;  %v603_v19 = vand.u32 4294901760, %v602_v21  ;;  %v623_v31 = vand.u32 4294901760, %v622_v0  ;;  %v1344_v50 = vld [vmem:[%s2854_s3 + $0x10] sm:$0xff]  ;;  %v1347_v21 = vld [vmem:[%s2854_s3 + $0x28] sm:$0xff] }
 0x135   :  { %1912 = vmatprep.mubr.f32.mxu1 %v2571_v9  ;;  %1884 = vmatmul.mubr.f32.gmra.mrb[24].mxu0 %v593_v34  ;;  %v632_v28 = vsub.f32 %v630_v56, %v631_v12  ;;  %v1348_v34 = vld [vmem:[%s2854_s3 + $0x30] sm:$0xff] }
 0x136   :  { %1886 = vmatprep.mubr.f32.mxu0 %v603_v19  ;;  %v611_v62 = vand.u32 4294901760, %v610_v16  ;;  %v1351_v19 = vld [vmem:[%s2854_s3 + $0x48] sm:$0xff] }
 0x137   :  { %v633_v32 = vand.u32 4294901760, %v632_v28 }
 0x138   :  { %1913 = vmatmul.mubr.f32.gmra.mrb[8].mxu1 %v2596_v3  ;;  %v612_v24 = vsub.f32 %v610_v16, %v611_v62 }
 0x139   :  { %1923 = vmatprep.mubr.f32.mxu1 %v2480_v17  ;;  %v1353_v17 = vld [vmem:[%s2855_s4 + $0x8] sm:$0xff] }
 0x13a   :  { %v613_v25 = vand.u32 4294901760, %v612_v24 }
 0x13c   :  { %1887 = vmatmul.mubr.f32.gmra.mrb[26].mxu0 %v613_v25  ;;  %1924 = vmatmul.mubr.f32.vlgmr.msra.gmra.mrb[0].mxu1 %v2496_v47  ;;  %v1356_v47 = vld [vmem:[%s2855_s4 + $0x20] sm:$0xff] }
 0x13d   :  { %1889 = vmatprep.mubr.f32.mxu0 %v623_v31  ;;  %1926 = vmatprep.mubr.f32.mxu1 %v2534_v39  ;;  %v1361_v39 = vld [vmem:[%s2855_s4 + $0x48] sm:$0xff] }
 0x13e   :  { %2069 = vmatpush3.bf16.msra.mxu1 %v2350_v48 }
 0x13f   :  { %2071 = vmatprep.subr.bf16.mxu1 %v2354_v49 }
 0x140   :  { %1890 = vmatmul.mubr.f32.gmra.mrb[28].mxu0 %v633_v32  ;;  %1927 = vmatmul.mubr.f32.gmra.mrb[2].mxu1 %v2558_v33 }
 0x141   :  { %1929 = vmatprep.mubr.f32.mxu1 %v2528_v18 }
 0x142   :  { %2073 = vmatpush3.bf16.msra.mxu1 %v2354_v49 }
 0x143   :  { %2075 = vmatprep.subr.bf16.mxu1 %v2363_v52 }
 0x144   :  { %1930 = vmatmul.mubr.f32.gmra.mrb[4].mxu1 %v2548_v29 }
 0x145   :  { %1932 = vmatprep.mubr.f32.mxu1 %v600_v61 }
 0x148   :  { %1933 = vmatmul.mubr.f32.gmra.mrb[6].mxu1 %v610_v16  ;;  %v1350_v16 = vld [vmem:[%s2854_s3 + $0x40] sm:$0xff] }
 0x149   :  { %1935 = vmatprep.mubr.f32.mxu1 %v2590_v27 }
 0x14c   :  { %1936 = vmatmul.mubr.f32.gmra.mrb[8].mxu1 %v630_v56  ;;  %v1345_v56 = vld [vmem:[%s2854_s3 + $0x18] sm:$0xff] }
 0x14d   :  { %1946 = vmatprep.mubr.f32.mxu1 %v541_v45  ;;  %v1357_v45 = vld [vmem:[%s2855_s4 + $0x28] sm:$0xff] }
 0x150   :  { %1947 = vmatmul.mubr.f32.vlgmr.msra.gmra.mrb[0].mxu1 %v551_v2 }
 0x151   :  { %1949 = vmatprep.mubr.f32.mxu1 %v561_v1  ;;  %2077 = vmatpush3.bf16.msra.mxu1 %v2363_v52  ;;  %v1354_v52 = vld [vmem:[%s2855_s4 + $0x10] sm:$0xff] }
 0x152   :  { %2079 = vmatprep.subr.bf16.mxu1 %v2365_v53 }
 0x154   :  { %1950 = vmatmul.mubr.f32.gmra.mrb[2].mxu1 %v571_v5 }
 0x155   :  { %1952 = vmatprep.mubr.f32.mxu1 %v581_v51  ;;  %2081 = vmatpush3.bf16.msra.mxu1 %v2365_v53  ;;  %v1352_v53 = vld [vmem:[%s2855_s4] sm:$0xff] }
 0x156   :  { %2083 = vmatprep.subr.bf16.mxu1 %v2350_v48 }
 0x158   :  { %1953 = vmatmul.mubr.f32.gmra.mrb[4].mxu1 %v591_v38 }
 0x159   :  { %1955 = vmatprep.mubr.f32.mxu1 %v601_v7  ;;  %v1343_v7 = vld [vmem:[%s2854_s3 + $0x8] sm:$0xff] }
 0x15c   :  { %1956 = vmatmul.mubr.f32.gmra.mrb[6].mxu1 %v611_v62 }
 0x15d   :  { %1958 = vmatprep.mubr.f32.mxu1 %v621_v13  ;;  %v1349_v13 = vld [vmem:[%s2854_s3 + $0x38] sm:$0xff] }
 0x160   :  { %1959 = vmatmul.mubr.f32.gmra.mrb[8].mxu1 %v631_v12 }
 0x161   :  { %1969 = vmatprep.mubr.f32.mxu1 %v2471_v26 }
 0x164   :  { %1970 = vmatmul.mubr.f32.vlgmr.msra.gmra.mrb[0].mxu1 %v2484_v40 }
 0x165   :  { %1972 = vmatprep.mubr.f32.mxu1 %v2524_v57  ;;  %2085 = vmatpush3.bf16.msra.mxu1 %v2350_v48  ;;  %v1342_v48 = vld [vmem:[%s2854_s3] sm:$0xff] }
 0x166   :  { %2087 = vmatprep.subr.bf16.mxu1 %v2354_v49  ;;  %2027 = vmatprep.mubr.msk.f32.mxu0 %vm1412_vm7, %v1342_v48 }
 0x168   :  { %1973 = vmatmul.mubr.f32.gmra.mrb[2].mxu1 %v2540_v23 }
 0x169   :  { %1975 = vmatprep.mubr.f32.mxu1 %v2514_v59  ;;  %2089 = vmatpush3.bf16.msra.mxu1 %v2354_v49  ;;  %v2243_v49 = vmov 0  }
 0x16a   :  { %2163 = vset.pattern.permute.xlu1 %v2243_v49  ;;  %2162 = vset.pattern.permute.xlu0 %v2243_v49 }
 0x16b   :  { %1374 = vperm.xlu1 %2163, %v1354_v52   ;;  %1364 = vperm.xlu0 %2162, %v1352_v53  }
 0x16c   :  { %1976 = vmatmul.mubr.f32.gmra.mrb[4].mxu1 %v2536_v22 }
 0x16d   :  { %1978 = vmatprep.mubr.f32.mxu1 %v2578_v44 }
 0x16f   :  { %1369 = vperm.xlu0 %2162, %v1353_v17  }
 0x170   :  { %1979 = vmatmul.mubr.f32.gmra.mrb[6].mxu1 %v2603_v10 }
 0x171   :  { %1981 = vmatprep.mubr.f32.mxu1 %v2571_v9 }
 0x173   :  { %1384 = vperm.xlu0 %2162, %v1356_v47  }
 0x174   :  { %1982 = vmatmul.mubr.f32.gmra.mrb[8].mxu1 %v2596_v3 }
 0x175   :  { %1992 = vmatprep.mubr.f32.mxu1 %v2471_v26  ;;  %v1355_v26 = vld [vmem:[%s2855_s4 + $0x18] sm:$0xff] }
 0x176   :  { %1379 = vperm.xlu1 %2163, %v1355_v26  }
 0x178   :  { %1993 = vmatmul.mubr.f32.vlgmr.msra.gmra.mrb[0].mxu1 %v2484_v40 }
 0x179   :  { %1995 = vmatprep.mubr.f32.mxu1 %v2524_v57  ;;  %v1358_v57 = vld [vmem:[%s2855_s4 + $0x30] sm:$0xff] }
 0x17a   :  { %1389 = vperm.xlu1 %2163, %v1357_v45   ;;  %1394 = vperm.xlu0 %2162, %v1358_v57  }
 0x17c   :  { %1996 = vmatmul.mubr.f32.gmra.mrb[2].mxu1 %v2540_v23 }
 0x17d   :  { %1998 = vmatprep.mubr.f32.mxu1 %v2514_v59  ;;  %v1359_v59 = vld [vmem:[%s2855_s4 + $0x38] sm:$0xff] }
 0x17e   :  { %1399 = vperm.xlu1 %2163, %v1359_v59  }
 0x180   :  { %1999 = vmatmul.mubr.f32.gmra.mrb[4].mxu1 %v2536_v22  ;;  %v1360_v22 = vld [vmem:[%s2855_s4 + $0x40] sm:$0xff] }
 0x181   :  { %2001 = vmatprep.mubr.f32.mxu1 %v2578_v44  ;;  %1404 = vperm.xlu0 %2162, %v1360_v22  }
 0x182   :  { %1409 = vperm.xlu1 %2163, %v1361_v39  }
 0x184   :  { %2002 = vmatmul.mubr.f32.gmra.mrb[6].mxu1 %v2603_v10  ;;  %v1346_v10 = vld [vmem:[%s2854_s3 + $0x20] sm:$0xff] }
 0x185   :  { %2004 = vmatprep.mubr.f32.mxu1 %v2571_v9 }
 0x188   :  { %2005 = vmatmul.mubr.f32.gmra.mrb[8].mxu1 %v2596_v3 }
 0x1ea   :  { %v1375_v62 = vpop.permute.xlu1 %1374  ;;  %v1365_v12 = vpop.permute.xlu0 %1364 }
 0x1ee   :  { %v1370_v24 = vpop.permute.xlu0 %1369 }
 0x1f2   :  { %v1385_v26 = vpop.permute.xlu0 %1384 }
 0x1f5   :  { %v1380_v0 = vpop.permute.xlu1 %1379 }
 0x1f9   :  { %v1390_v49 = vpop.permute.xlu1 %1389 }
 0x1fc   :  { %v1879_v40 = vpop.f32.mrb[20].mxu0 }
 0x1fd   :  { %v545_v2 = vpop.f32.mrb[21].mxu0 }
 0x204   :  { %v1882_v18 = vpop.f32.mrb[22].mxu0 }
 0x205   :  { %v565_v23 = vpop.f32.mrb[23].mxu0 }
 0x208   :  { %v1885_v51 = vpop.f32.mrb[24].mxu0 }
 0x209   :  { %v585_v29 = vpop.f32.mrb[25].mxu0 }
 0x20f   :  { %v1888_v1 = vpop.f32.mrb[26].mxu0 }
 0x210   :  { %v605_v54 = vpop.f32.mrb[27].mxu0 }
 0x213   :  { %v1891_v33 = vpop.f32.mrb[28].mxu0 }
 0x214   :  { %v625_v35 = vpop.f32.mrb[29].mxu0 }
 0x24b   :  { %v1994_v36 = vpop.f32.mrb[0].mxu1 }
 0x24c   :  { %v2695_v37 = vadd.f32 %v1994_v36, %v1879_v40  ;;  %v1284_v8 = vpop.f32.mrb[1].mxu1 }
 0x24d   :  { %v2697_v20 = vadd.f32 %v1284_v8, %v545_v2 }
 0x24f   :  { %v2090_v38 = vpack.c.bf16 %v2695_v37, %v2697_v20  ;;  %v1997_v41 = vpop.f32.mrb[2].mxu1 }
 0x250   :  { %v2701_v9 = vadd.f32 %v1997_v41, %v1882_v18  ;;  %v1296_v42 = vpop.f32.mrb[3].mxu1 }
 0x251   :  { %v2703_v43 = vadd.f32 %v1296_v42, %v565_v23  ;;  %2091 = vmatprep.subr.bf16.mxu0 %v2090_v38 }
 0x252   :  { %2093 = vmatpush3.bf16.msra.mxu0 %v2090_v38 }
 0x253   :  { %v2094_v5 = vpack.c.bf16 %v2701_v9, %v2703_v43  ;;  %v2000_v44 = vpop.f32.mrb[4].mxu1 }
 0x254   :  { %v2707_v46 = vadd.f32 %v2000_v44, %v1885_v51  ;;  %v1308_v58 = vpop.f32.mrb[5].mxu1  ;;  %v1400_v51 = vpop.permute.xlu1 %1399 }
 0x255   :  { %v2709_v60 = vadd.f32 %v1308_v58, %v585_v29  ;;  %2095 = vmatprep.subr.bf16.mxu0 %v2094_v5 }
 0x256   :  { %2097 = vmatpush3.bf16.msra.mxu0 %v2094_v5 }
 0x257   :  { %v2098_v14 = vpack.c.bf16 %v2707_v46, %v2709_v60  ;;  %v2003_v11 = vpop.f32.mrb[6].mxu1 }
 0x258   :  { %v2713_v27 = vadd.f32 %v2003_v11, %v1888_v1  ;;  %v1320_v61 = vpop.f32.mrb[7].mxu1  ;;  %v1410_v58 = vpop.permute.xlu1 %1409 }
 0x259   :  { %v2715_v63 = vadd.f32 %v1320_v61, %v605_v54  ;;  %2099 = vmatprep.subr.bf16.mxu0 %v2098_v14  ;;  %v1395_v54 = vpop.permute.xlu0 %1394 }
 0x25a   :  { %2101 = vmatpush3.bf16.msra.mxu0 %v2098_v14 }
 0x25b   :  { %v2102_v4 = vpack.c.bf16 %v2713_v27, %v2715_v63  ;;  %v2006_v3 = vpop.f32.mrb[8].mxu1 }
 0x25c   :  { %v2719_v15 = vadd.f32 %v2006_v3, %v1891_v33  ;;  %v1332_v55 = vpop.f32.mrb[9].mxu1 }
 0x25d   :  { %v2721_v30 = vadd.f32 %v1332_v55, %v625_v35  ;;  %2103 = vmatprep.subr.bf16.mxu0 %v2102_v4 }
 0x25e   :  { %2105 = vmatpush3.bf16.msra.mxu0 %v2102_v4  ;;  %v1405_v4 = vpop.permute.xlu0 %1404 }
 0x25f   :  { %v2106_v6 = vpack.c.bf16 %v2719_v15, %v2721_v30 }
 0x261   :  { %2107 = vmatprep.subr.bf16.mxu0 %v2106_v6 }
 0x262   :  { %2109 = vmatpush3.bf16.msra.mxu0 %v2106_v6 }
 0x265   :  { %2028 = vmatmul.mubr.msk.f32.vlgmr.msra.gmra.mrb[30].mxu0 %vm1412_vm7, %v1343_v7 }
 0x266   :  { %2030 = vmatprep.mubr.msk.f32.mxu0 %vm1412_vm7, %v1344_v50 }
 0x269   :  { %2031 = vmatmul.mubr.msk.f32.gmra.mrb[32].mxu0 %vm1412_vm7, %v1345_v56 }
 0x26a   :  { %2033 = vmatprep.mubr.msk.f32.mxu0 %vm1412_vm7, %v1346_v10 }
 0x26d   :  { %2034 = vmatmul.mubr.msk.f32.gmra.mrb[34].mxu0 %vm1412_vm7, %v1347_v21 }
 0x26e   :  { %2036 = vmatprep.mubr.msk.f32.mxu0 %vm1412_vm7, %v1348_v34 }
 0x271   :  { %2037 = vmatmul.mubr.msk.f32.gmra.mrb[36].mxu0 %vm1412_vm7, %v1349_v13 }
 0x272   :  { %2039 = vmatprep.mubr.msk.f32.mxu0 %vm1412_vm7, %v1350_v16 }
 0x275   :  { %2040 = vmatmul.mubr.msk.f32.gmra.mrb[38].mxu0 %vm1412_vm7, %v1351_v19 }
 0x338   :  { %v2029_v25 = vpop.f32.mrb[30].mxu0 }
 0x339   :  { %v1515_v28 = vadd.f32 %v2029_v25, %v1370_v24  ;;  %v1509_v31 = vpop.f32.mrb[31].mxu0 }
 0x33a   :  { %v1510_v32 = vadd.f32 %v1509_v31, %v1365_v12 }
 0x33b   :  { %v1569_v48 = vmin.f32 %v1515_v28, 0.0  ;;  %vm1559_vm10 = vcmp.gt.f32.partialorder %v1515_v28, 0.0 }
 0x33c   :  { %v1568_v52 = vmin.f32 %v1510_v32, 0.0  ;;  %v2032_v53 = vpop.f32.mrb[32].mxu0  ;;  %vm1558_vm11 = vcmp.gt.f32.partialorder %v1510_v32, 0.0 }
 0x33d   :  { %v1580_v17 = vmul.f32 1.442695, %v1569_v48  ;;  %v2761_v40 = vadd.f32 %v2032_v53, %v1380_v0  ;;  %v1519_v45 = vpop.f32.mrb[33].mxu0 }
 0x33e   :  { %v1578_v47 = vmul.f32 1.442695, %v1568_v52  ;;  %v2763_v2 = vadd.f32 %v1519_v45, %v1375_v62 }
 0x33f   :  { %2222 = vpow2.f32 %v1580_v17  ;;  %v1571_v59 = vmin.f32 %v2761_v40, 0.0  ;;  %vm1561_vm12 = vcmp.gt.f32.partialorder %v2761_v40, 0.0 }
 0x340   :  { %2224 = vpow2.f32 %v1578_v47  ;;  %v1570_v57 = vmin.f32 %v2763_v2, 0.0  ;;  %v2035_v18 = vpop.f32.mrb[34].mxu0  ;;  %vm1560_vm13 = vcmp.gt.f32.partialorder %v2763_v2, 0.0 }
 0x341   :  { %v1584_v39 = vmul.f32 1.442695, %v1571_v59  ;;  %v2767_v22 = vadd.f32 %v2035_v18, %v1390_v49  ;;  %v1529_v23 = vpop.f32.mrb[35].mxu0 }
 0x342   :  { %v1582_v29 = vmul.f32 1.442695, %v1570_v57  ;;  %v2769_v1 = vadd.f32 %v1529_v23, %v1385_v26 }
 0x343   :  { %2226 = vpow2.f32 %v1584_v39  ;;  %v1573_v33 = vmin.f32 %v2767_v22, 0.0  ;;  %vm1563_vm14 = vcmp.gt.f32.partialorder %v2767_v22, 0.0 }
 0x344   :  { %2228 = vpow2.f32 %v1582_v29  ;;  %v1572_v35 = vmin.f32 %v2769_v1, 0.0  ;;  %v2038_v36 = vpop.f32.mrb[36].mxu0  ;;  %vm1562_vm15 = vcmp.gt.f32.partialorder %v2769_v1, 0.0 }
 0x345   :  { %v1588_v8 = vmul.f32 1.442695, %v1573_v33  ;;  %v2773_v38 = vadd.f32 %v2038_v36, %v1400_v51  ;;  %v1539_v41 = vpop.f32.mrb[37].mxu0 }
 0x346   :  { %v1586_v42 = vmul.f32 1.442695, %v1572_v35  ;;  %v2775_v5 = vadd.f32 %v1539_v41, %v1395_v54 }
 0x347   :  { %2230 = vpow2.f32 %v1588_v8  ;;  %v1575_v44 = vmin.f32 %v2773_v38, 0.0  ;;  %vm1565_vm0 = vcmp.gt.f32.partialorder %v2773_v38, 0.0 }
 0x348   :  { %2232 = vpow2.f32 %v1586_v42  ;;  %v1574_v14 = vmin.f32 %v2775_v5, 0.0  ;;  %v2041_v11 = vpop.f32.mrb[38].mxu0  ;;  %vm1564_vm1 = vcmp.gt.f32.partialorder %v2775_v5, 0.0 }
 0x349   :  { %v2223_v61 = vpop.eup %2222  ;;  %v1592_v3 = vmul.f32 1.442695, %v1575_v44  ;;  %v2779_v55 = vadd.f32 %v2041_v11, %v1410_v58  ;;  %v1549_v6 = vpop.f32.mrb[39].mxu0 }
 0x34a   :  { %v2225_v7 = vpop.eup %2224  ;;  %v1702_v50 = vadd.f32 -1.0, %v2223_v61  ;;  %v1590_v56 = vmul.f32 1.442695, %v1574_v14  ;;  %v2781_v10 = vadd.f32 %v1549_v6, %v1405_v4 }
 0x34b   :  { %v1701_v21 = vadd.f32 -1.0, %v2225_v7  ;;  %2234 = vpow2.f32 %v1592_v3  ;;  %v1577_v34 = vmin.f32 %v2779_v55, 0.0  ;;  %vm1567_vm2 = vcmp.gt.f32.partialorder %v2779_v55, 0.0 }
 0x34c   :  { %v1609_v13 = vsel %vm1559_vm10, %v1515_v28, %v1702_v50  ;;  %2236 = vpow2.f32 %v1590_v56  ;;  %v1576_v16 = vmin.f32 %v2781_v10, 0.0  ;;  %vm1566_vm3 = vcmp.gt.f32.partialorder %v2781_v10, 0.0 }
 0x34d   :  { %v2227_v19 = vpop.eup %2226  ;;  %v1619_v62 = vadd.f32 %v2695_v37, %v1609_v13  ;;  %v1608_v12 = vsel %vm1558_vm11, %v1510_v32, %v1701_v21  ;;  %v1596_v0 = vmul.f32 1.442695, %v1577_v34 }
 0x34e   :  { %v2229_v24 = vpop.eup %2228  ;;  %v1618_v25 = vadd.f32 %v2697_v20, %v1608_v12  ;;  %v1704_v31 = vadd.f32 -1.0, %v2227_v19  ;;  %v1594_v48 = vmul.f32 1.442695, %v1576_v16 }
 0x34f   :  { %1630 = vst.msk [vmem:[%s2856_s5 + $0x8] sm:$0xff] %vm1628_vm9, %v1619_v62  ;;  %v1703_v28 = vadd.f32 -1.0, %v2229_v24  ;;  %2238 = vpow2.f32 %v1596_v0 }
 0x350   :  { %1629 = vst.msk [vmem:[%s2856_s5] sm:$0xff] %vm1628_vm9, %v1618_v25  ;;  %v1611_v37 = vsel %vm1561_vm12, %v2761_v40, %v1704_v31  ;;  %2240 = vpow2.f32 %v1594_v48 }
 0x351   :  { %v2231_v20 = vpop.eup %2230  ;;  %v1621_v32 = vadd.f32 %v2701_v9, %v1611_v37  ;;  %v1610_v49 = vsel %vm1560_vm13, %v2763_v2, %v1703_v28 }
 0x352   :  { %v2233_v52 = vpop.eup %2232  ;;  %v1620_v53 = vadd.f32 %v2703_v43, %v1610_v49  ;;  %v1706_v26 = vadd.f32 -1.0, %v2231_v20 }
 0x353   :  { %1632 = vst.msk [vmem:[%s2856_s5 + $0x18] sm:$0xff] %vm1628_vm9, %v1621_v32  ;;  %v1705_v17 = vadd.f32 -1.0, %v2233_v52 }
 0x354   :  { %1631 = vst.msk [vmem:[%s2856_s5 + $0x10] sm:$0xff] %vm1628_vm9, %v1620_v53  ;;  %v1613_v9 = vsel %vm1563_vm14, %v2767_v22, %v1706_v26 }
 0x355   :  { %v2235_v40 = vpop.eup %2234  ;;  %v1623_v43 = vadd.f32 %v2707_v46, %v1613_v9  ;;  %v1612_v45 = vsel %vm1562_vm15, %v2769_v1, %v1705_v17 }
 0x356   :  { %v2237_v47 = vpop.eup %2236  ;;  %v1622_v2 = vadd.f32 %v2709_v60, %v1612_v45  ;;  %v1708_v59 = vadd.f32 -1.0, %v2235_v40 }
 0x357   :  { %1634 = vst.msk [vmem:[%s2856_s5 + $0x28] sm:$0xff] %vm1628_vm9, %v1623_v43  ;;  %v1707_v57 = vadd.f32 -1.0, %v2237_v47 }
 0x358   :  { %1633 = vst.msk [vmem:[%s2856_s5 + $0x20] sm:$0xff] %vm1628_vm9, %v1622_v2  ;;  %v1615_v46 = vsel %vm1565_vm0, %v2773_v38, %v1708_v59 }
 0x359   :  { %v2239_v18 = vpop.eup %2238  ;;  %v1625_v60 = vadd.f32 %v2713_v27, %v1615_v46  ;;  %v1614_v39 = vsel %vm1564_vm1, %v2775_v5, %v1707_v57 }
 0x35a   :  { %v2241_v22 = vpop.eup %2240  ;;  %v1624_v23 = vadd.f32 %v2715_v63, %v1614_v39  ;;  %v1710_v51 = vadd.f32 -1.0, %v2239_v18 }
 0x35b   :  { %1636 = vst.msk [vmem:[%s2856_s5 + $0x38] sm:$0xff] %vm1628_vm9, %v1625_v60  ;;  %v1709_v29 = vadd.f32 -1.0, %v2241_v22 }
 0x35c   :  { %1635 = vst.msk [vmem:[%s2856_s5 + $0x30] sm:$0xff] %vm1628_vm9, %v1624_v23  ;;  %v1617_v27 = vsel %vm1567_vm2, %v2779_v55, %v1710_v51 }
 0x35d   :  { %v1627_v63 = vadd.f32 %v2719_v15, %v1617_v27  ;;  %v1616_v1 = vsel %vm1566_vm3, %v2781_v10, %v1709_v29 }
 0x35e   :  { %v1626_v54 = vadd.f32 %v2721_v30, %v1616_v1 }
 0x35f   :  { %1638 = vst.msk [vmem:[%s2856_s5 + $0x48] sm:$0xff] %vm1628_vm9, %v1627_v63 }
 0x360   :  { %1637 = vst.msk [vmem:[%s2856_s5 + $0x40] sm:$0xff] %vm1628_vm9, %v1626_v54 }

</bundles_post_ra>
